<compile_context>
chip_gen: v5e
topology: v5e:2x2
jax: 0.10.0
libtpu: 0.0.40
codegen_flags: <defaults>
</compile_context>

<pallas_src>
import functools

import jax
import jax.numpy as jnp
from jax.experimental import pallas as pl
from jax.experimental.pallas import tpu as pltpu


def _round_up(a, b):
    return (a + b - 1) // b * b


def _se_kernel(x_ref, w1_ref, b1_ref, w2_ref, b2_ref, o_ref):
    """One (batch, lane-tile) block: x_ref is (1, C, TL); compute is pure matmul/VPU."""
    x = x_ref[0].astype(jnp.float32)                                    # (C, TL)

    # 1x1 Conv1d #1 with the cumulative-mean fold: h = W1' @ x + b1
    h = jnp.dot(w1_ref[...].astype(jnp.float32), x,
                preferred_element_type=jnp.float32)
    h = h + b1_ref[...].astype(jnp.float32)                             # (Ci, TL)
    h = h * jax.nn.sigmoid(h)                                           # SiLU

    # 1x1 Conv1d #2: g = W2 @ h + b2
    g = jnp.dot(w2_ref[...].astype(jnp.float32), h,
                preferred_element_type=jnp.float32)
    g = g + b2_ref[...].astype(jnp.float32)                             # (C, TL)

    o_ref[0] = (x * jax.nn.sigmoid(g)).astype(o_ref.dtype)


@functools.partial(jax.jit, static_argnames=("tile_l",))
def squeeze_excite(x, w1, b1, w2, b2, *, tile_l=2048):
    """x: (B, C, L); w1: (Ci, C); b1: (Ci, 1); w2: (C, Ci); b2: (C, 1)."""
    B, C, L = x.shape
    Ci = w1.shape[0]

    # --- Fold the cumulative mean over channels into W1 (once, outside the kernel).
    idx = jnp.arange(C)
    tri = (idx[None, :] <= idx[:, None]).astype(jnp.float32)            # lower-tri ones
    m = tri / jnp.arange(1, C + 1, dtype=jnp.float32)[:, None]          # (C, C)
    w1_eff = jnp.dot(w1.astype(jnp.float32), m)                         # (Ci, C) = W1'
    b1f = b1.astype(jnp.float32)
    w2f = w2.astype(jnp.float32)
    b2f = b2.astype(jnp.float32)

    # --- Lane-tile along L: large multiple of 128, capped so the f32 x tile
    #     stays <= ~2 MiB (double-buffered in + out + temporaries fit well
    #     under the 32 MiB scoped-VMEM limit on v5e/v6e/v7x).
    lane = 128
    cap = max(lane, ((1 << 19) // max(C, 1)) // lane * lane)
    tl = max(1, min(int(tile_l), cap))
    if L <= tl:
        tl, l_pad = L, L                      # one full-L block per batch, no padding copy
    else:
        tl = max(lane, (tl // lane) * lane)   # lane-dense tiles
        l_pad = _round_up(L, tl)

    xp = x if l_pad == L else jnp.pad(x, ((0, 0), (0, 0), (0, l_pad - L)))

    out = pl.pallas_call(
        _se_kernel,
        out_shape=jax.ShapeDtypeStruct((B, C, l_pad), x.dtype),
        grid=(B, l_pad // tl),
        in_specs=[
            pl.BlockSpec((1, C, tl), lambda b, i: (b, 0, i)),   # x tile
            pl.BlockSpec((Ci, C), lambda b, i: (0, 0)),         # W1' (resident)
            pl.BlockSpec((Ci, 1), lambda b, i: (0, 0)),         # b1
            pl.BlockSpec((C, Ci), lambda b, i: (0, 0)),         # W2
            pl.BlockSpec((C, 1), lambda b, i: (0, 0)),          # b2
        ],
        out_specs=pl.BlockSpec((1, C, tl), lambda b, i: (b, 0, i)),
        compiler_params=pltpu.CompilerParams(
            dimension_semantics=("parallel", "parallel"),       # independent tiles (v7x: 2 TCs)
            vmem_limit_bytes=32 * 1024 * 1024,
        ),
    )(xp, w1_eff, b1f, w2f, b2f)

    return out if l_pad == L else out[:, :, :L]


def squeeze_excite_ref(x, w1, b1, w2, b2):
    """Pure-JAX reference mirroring the PyTorch forward (un-folded cumsum)."""
    C = x.shape[-2]
    cum_sum = jnp.cumsum(x.astype(jnp.float32), axis=-2)
    denom = jnp.arange(1, C + 1, dtype=jnp.float32)[:, None]
    cum_mean = cum_sum / denom
    h = jnp.einsum("ic,bcl->bil", w1, cum_mean) + b1[None]
    h = h * jax.nn.sigmoid(h)
    g = jnp.einsum("ci,bil->bcl", w2, h) + b2[None]
    return (x * jax.nn.sigmoid(g)).astype(x.dtype)


if __name__ == "__main__":
    # Module config: dim = number of channels, dim_inner = max(8, dim // 4)
    B, dim, L = 2, 16, 64
    dim_inner = max(8, dim // 4)

    key = jax.random.PRNGKey(0)
    kx, k1, k2, k3, k4 = jax.random.split(key, 5)

    x = jax.random.normal(kx, (B, dim, L), dtype=jnp.float32)
    # Conv1d with kernel_size=1 -> plain matrices (+ per-channel bias)
    w1 = jax.random.normal(k1, (dim_inner, dim), dtype=jnp.float32) * 0.1
    b1 = jax.random.normal(k2, (dim_inner, 1), dtype=jnp.float32) * 0.1
    w2 = jax.random.normal(k3, (dim, dim_inner), dtype=jnp.float32) * 0.1
    b2 = jax.random.normal(k4, (dim, 1), dtype=jnp.float32) * 0.1

    out = squeeze_excite(x, w1, b1, w2, b2)
    out = jax.block_until_ready(out)

    ref = squeeze_excite_ref(x, w1, b1, w2, b2)
    assert out.shape == x.shape and out.dtype == x.dtype
    # Folding the cumulative mean into W1 reorders f32 accumulation slightly.
    assert jnp.allclose(out, ref, atol=2e-5, rtol=2e-5), "mismatch vs reference"

    print("KERNEL_OK")
</pallas_src>

<mosaic_0001>
module attributes {stable_mosaic.version = 11 : i64} {
  func.func @_se_kernel(%arg0: i32, %arg1: i32, %arg2: memref<1x16x64xf32, #tpu.memory_space<vmem>>, %arg3: memref<8x16xf32, #tpu.memory_space<vmem>>, %arg4: memref<8x1xf32, #tpu.memory_space<vmem>>, %arg5: memref<16x8xf32, #tpu.memory_space<vmem>>, %arg6: memref<16x1xf32, #tpu.memory_space<vmem>>, %arg7: memref<1x16x64xf32, #tpu.memory_space<vmem>>) attributes {dimension_semantics = [#tpu.dimension_semantics<parallel>, #tpu.dimension_semantics<parallel>], iteration_bounds = array<i64: 2, 1>, scalar_prefetch = 0 : i64, scratch_operands = 0 : i64, tpu.core_type = #tpu.core_type<tc>, window_params = [{transform_indices = @transform_0, window_bounds = array<i64: 1, 16, 64>}, {pipeline_mode = #tpu.pipeline_mode<synchronous>, transform_indices = @transform_1, window_bounds = array<i64: 8, 16>}, {pipeline_mode = #tpu.pipeline_mode<synchronous>, transform_indices = @transform_2, window_bounds = array<i64: 8, 1>}, {pipeline_mode = #tpu.pipeline_mode<synchronous>, transform_indices = @transform_3, window_bounds = array<i64: 16, 8>}, {pipeline_mode = #tpu.pipeline_mode<synchronous>, transform_indices = @transform_4, window_bounds = array<i64: 16, 1>}, {transform_indices = @transform_5, window_bounds = array<i64: 1, 16, 64>}]} {
    %c0 = arith.constant 0 : index
    %c0_0 = arith.constant 0 : index
    %c0_1 = arith.constant 0 : index
    %0 = vector.load %arg2[%c0, %c0_0, %c0_1] : memref<1x16x64xf32, #tpu.memory_space<vmem>>, vector<1x16x64xf32>
    %1 = vector.shape_cast %0 : vector<1x16x64xf32> to vector<16x64xf32>
    %c0_2 = arith.constant 0 : index
    %c0_3 = arith.constant 0 : index
    %2 = vector.load %arg3[%c0_2, %c0_3] : memref<8x16xf32, #tpu.memory_space<vmem>>, vector<8x16xf32>
    %cst = arith.constant dense<0.000000e+00> : vector<8x64xf32>
    %3 = tpu.matmul %2, %1, %cst {dimension_numbers = #tpu.dot_dimension_numbers<[1], [0], [0], [1], [0, 0, 1, 1], [], []>} : vector<8x16xf32>, vector<16x64xf32>, vector<8x64xf32> -> vector<8x64xf32>
    %c0_4 = arith.constant 0 : index
    %c0_5 = arith.constant 0 : index
    %4 = vector.load %arg4[%c0_4, %c0_5] : memref<8x1xf32, #tpu.memory_space<vmem>>, vector<8x1xf32>
    %5 = vector.broadcast %4 : vector<8x1xf32> to vector<8x64xf32>
    %6 = arith.addf %3, %5 : vector<8x64xf32>
    %7 = arith.negf %6 : vector<8x64xf32>
    %8 = math.exp %7 : vector<8x64xf32>
    %cst_6 = arith.constant 1.000000e+00 : f32
    %9 = vector.broadcast %cst_6 : f32 to vector<8x64xf32>
    %10 = arith.addf %9, %8 : vector<8x64xf32>
    %11 = arith.divf %9, %10 : vector<8x64xf32>
    %12 = arith.mulf %6, %11 : vector<8x64xf32>
    %c0_7 = arith.constant 0 : index
    %c0_8 = arith.constant 0 : index
    %13 = vector.load %arg5[%c0_7, %c0_8] : memref<16x8xf32, #tpu.memory_space<vmem>>, vector<16x8xf32>
    %cst_9 = arith.constant dense<0.000000e+00> : vector<16x64xf32>
    %14 = tpu.matmul %13, %12, %cst_9 {dimension_numbers = #tpu.dot_dimension_numbers<[1], [0], [0], [1], [0, 0, 1, 1], [], []>} : vector<16x8xf32>, vector<8x64xf32>, vector<16x64xf32> -> vector<16x64xf32>
    %c0_10 = arith.constant 0 : index
    %c0_11 = arith.constant 0 : index
    %15 = vector.load %arg6[%c0_10, %c0_11] : memref<16x1xf32, #tpu.memory_space<vmem>>, vector<16x1xf32>
    %16 = vector.broadcast %15 : vector<16x1xf32> to vector<16x64xf32>
    %17 = arith.addf %14, %16 : vector<16x64xf32>
    %18 = arith.negf %17 : vector<16x64xf32>
    %19 = math.exp %18 : vector<16x64xf32>
    %cst_12 = arith.constant 1.000000e+00 : f32
    %20 = vector.broadcast %cst_12 : f32 to vector<16x64xf32>
    %21 = arith.addf %20, %19 : vector<16x64xf32>
    %22 = arith.divf %20, %21 : vector<16x64xf32>
    %23 = arith.mulf %1, %22 : vector<16x64xf32>
    %c0_13 = arith.constant 0 : index
    %c0_14 = arith.constant 0 : index
    %c0_15 = arith.constant 0 : index
    %24 = vector.load %arg7[%c0_13, %c0_14, %c0_15] : memref<1x16x64xf32, #tpu.memory_space<vmem>>, vector<1x16x64xf32>
    %25 = vector.shape_cast %24 : vector<1x16x64xf32> to vector<16x64xf32>
    %26 = vector.shape_cast %23 : vector<16x64xf32> to vector<1x16x64xf32>
    tpu.vector_store %arg7[%c0_13, %c0_14, %c0_15], %26 {strides = array<i32>} : memref<1x16x64xf32, #tpu.memory_space<vmem>>, vector<1x16x64xf32>,
    return
  }
  func.func @transform_0(%arg0: i32, %arg1: i32) -> (i32, i32, i32) {
    %c0_i32 = arith.constant 0 : i32
    %c0_i32_0 = arith.constant 0 : i32
    return %arg0, %c0_i32, %arg1 : i32, i32, i32
  }
  func.func @transform_1(%arg0: i32, %arg1: i32) -> (i32, i32) {
    %c0_i32 = arith.constant 0 : i32
    %c0_i32_0 = arith.constant 0 : i32
    %c0_i32_1 = arith.constant 0 : i32
    return %c0_i32, %c0_i32_0 : i32, i32
  }
  func.func @transform_2(%arg0: i32, %arg1: i32) -> (i32, i32) {
    %c0_i32 = arith.constant 0 : i32
    %c0_i32_0 = arith.constant 0 : i32
    %c0_i32_1 = arith.constant 0 : i32
    return %c0_i32, %c0_i32_0 : i32, i32
  }
  func.func @transform_3(%arg0: i32, %arg1: i32) -> (i32, i32) {
    %c0_i32 = arith.constant 0 : i32
    %c0_i32_0 = arith.constant 0 : i32
    %c0_i32_1 = arith.constant 0 : i32
    return %c0_i32, %c0_i32_0 : i32, i32
  }
  func.func @transform_4(%arg0: i32, %arg1: i32) -> (i32, i32) {
    %c0_i32 = arith.constant 0 : i32
    %c0_i32_0 = arith.constant 0 : i32
    %c0_i32_1 = arith.constant 0 : i32
    return %c0_i32, %c0_i32_0 : i32, i32
  }
  func.func @transform_5(%arg0: i32, %arg1: i32) -> (i32, i32, i32) {
    %c0_i32 = arith.constant 0 : i32
    %c0_i32_0 = arith.constant 0 : i32
    return %arg0, %c0_i32, %arg1 : i32, i32, i32
  }
}

</mosaic_0001>

<bundles_post_ra>
// kernel: squeeze_excite.1
= control target key start
LH: loop header
LB: loop body
LE: loop exit
PB: predicated region body
PF: predicated region fallthrough
CT: control target
= control target key end

     0   :  { %10 = vsyncpa [#allocation3], 0  ;;  %s819_s0 = inlined_call_operand.vmem [shape: f32[2,16,64], index: 0, kind: input, shape index: {}]   ;;  %s820_s1 = inlined_call_operand.vmem [shape: f32[8,16], index: 1, kind: input, shape index: {}]   ;;  %s821_s2 = inlined_call_operand.vmem [shape: f32[8,1], index: 2, kind: input, shape index: {}]   ;;  %s822_s3 = inlined_call_operand.vmem [shape: f32[16,8], index: 3, kind: input, shape index: {}]   ;;  %s823_s4 = inlined_call_operand.vmem [shape: f32[16,1], index: 4, kind: input, shape index: {}]   ;;  %s824_s5 = inlined_call_operand.hbm [shape: f32[2,16,64], index: 5, kind: output, shape index: {}]  }
   0x1   :  { %12 = vsyncpa [#allocation3 + $0x1], 0  ;;  %s690_s18 = smov 0   ;;  %s692_s19 = smov 0  }
   0x2   :  { %s694_s20 = smov 0   ;;  %s696_s21 = smov 0  }
   0x3   :  { %s698_s22 = smov 0   ;;  %s700_s23 = smov 0  }
   0x4 LB: > { %s483_s24 = sadd.s32 4294967295, %s655_s23   ;;  %s484_s25 = sadd.s32 4294967294, %s655_s23   ;;  %s655_s23 = sphi %s700_s23, %s18_s23   ;;  %s651_s22 = sphi %s698_s22, %s831_s22   ;;  %s647_s21 = sphi %s696_s21, %s830_s21   ;;  %s643_s20 = sphi %s694_s20, %s829_s20   ;;  %s639_s19 = sphi %s692_s19, %s828_s19   ;;  %s635_s18 = sphi %s690_s18, %s827_s18  }
   0x5   : > { %s30_s26 = sadd.s32 1, %s651_s22  ;;  %s151_s27 = sadd.s32 1, %s643_s20 }
   0x6   : > { %p32_p0 = scmp.ge.s32.totalorder %s30_s26, 2  ;;  %p161_p1 = scmp.ne.s32.totalorder %s643_s20, %s639_s19 }
   0x7   : > { %p162_p2 = scmp.eq.s32.totalorder %s483_s24, 1  ;;  %p167_p3 = scmp.ne.s32.totalorder %s639_s19, %s635_s18 }
   0x8   : > { %s833_s26 = smov (%p32_p0, %s30_s26), 0  ;;  %p168_p5 = scmp.eq.s32.totalorder %s484_s25, 1 }
   0x9   : > { %p730_p4 = por %p162_p2, %p161_p1  ;;  %s146_s29 = ssub.s32 %s651_s22, %s833_s26 }
   0xa   : > { %p487_p6 = scmp.ge.s32.totalorder %s655_s23, 1  ;;  %p149_p7 = scmp.eq.s32.totalorder %s146_s29, 0 }
   0xb   : > { %p737_p8 = por %p168_p5, %p167_p3  ;;  %p209_p9 = scmp.lt.s32.totalorder %s655_s23, 3 }
   0xc   : > { %s743_s6 = scalar_select %p149_p7, %s643_s20, %s151_s27  }
   0xd   : > { %p210_p10 = pnand %p487_p6, %p209_p9 }
   0xe   : > { %p240_p11 = scmp.lt.s32.totalorder (!%p210_p10), %s647_s21, 1  ;;  %s503_s11 = sshll.u32 (!%p210_p10), %s647_s21, 4 }
   0xf   : > { %213 = sbr.rel (%p210_p10) target bundleno = 355 (0x163), region = 40  ;;  %s401_s14 = scalar_lea.hbm (!%p210_p10), %s824_s5, %s503_s11 }
  0x10   : > { %s404_s16 = sshll.u32 (!%p210_p10), %s401_s14, 4  ;;  %s597_s7 = scalar_lea.hbm (!%p210_p10), %s824_s5, 32  ;;  %s405_s16 = int_to_ptr.hbm [resolvable:$true] %s404_s16 }
  0x11   : > { %s591_s24 = sshra.s32 (!%p210_p10), %s405_s16, 4  ;;  %s592_s24 = int_to_ptr.hbm [resolvable:$true] %s591_s24 }
  0x12   : > { %s593_s25 = scalar_lea.hbm (!%p210_p10), %s592_s24, 16  ;;  %p598_p1 = scmp.lt.s32.totalorder (!%p210_p10), %s592_s24, %s824_s5 }
  0x13   : > { %p594_p12 = scmp.ne.s32.totalorder (!%p210_p10), %s592_s24, %s593_s25  ;;  %p599_p2 = scmp.lt.s32.totalorder (!%p210_p10), %s597_s7, %s593_s25 }
  0x14   : > { %v251_v0 = vld [vmem:[%s821_s2] sm:$0xff]  ;;  %v657_v1 = vmov 0   ;;  %s241_s9 = scalar_select %p240_p11, %s647_s21, 1  ;;  %vm257_vm0 = vcmask 130048   ;;  %v304_v9 = vld [vmem:[%s823_s4 + $0x8] sm:$0xff]  ;;  %vm315_vm5 = vcmask 64512  }
  0x15   : > { %563 = vset.pattern.permute.xlu0 %v657_v1  ;;  %564 = vset.pattern.permute.xlu1 %v657_v1  ;;  %v250_v4 = vld [vmem:[%s820_s1] sm:$0xff]  ;;  %v302_v25 = vld [vmem:[%s822_s3 + $0x8] sm:$0xff]  ;;  %vm385_vm10 = vcmask 523264   ;;  %p595_p13 = pnand %p594_p12, %p730_p4  ;;  %p600_p3 = por %p599_p2, %p598_p1 }
  0x16   : > { %254 = vperm.xlu0 %563, %v251_v0   ;;  %s502_s10 = sshll.u32 %s241_s9, 4  ;;  %v303_v5 = vld [vmem:[%s823_s4] sm:$0xff]  ;;  %312 = vperm.xlu1 %564, %v304_v9   ;;  %s237_s9 = sand.u32 1, %s639_s19  }
  0x17   : > { %s247_s13 = scalar_lea.vmem %s819_s0, %s502_s10  ;;  %v301_v24 = vld [vmem:[%s822_s3] sm:$0xff]  ;;  %s488_s10 = sshll.u32 %s237_s9, 4 }
  0x18   : > { %v753_v2 = vld [vmem:[%s247_s13 + $0x8] sm:$0xff]  ;;  %v755_v3 = vld [vmem:[%s247_s13] sm:$0xff]  ;;  %s239_s21 = scalar_lea.vmem [#allocation2], %s488_s10  ;;  %s389_s17 = scalar_lea.sflag [#allocation3], %s237_s9 }
  0x19   : > { %275 = vmatpush.msra.mxu0 %v753_v2  ;;  %s402_s15 = sshll.u32 %s239_s21, 4  ;;  %p596_p0 = pneg %p595_p13  ;;  %s403_s15 = int_to_ptr.vmem [resolvable:$true] %s402_s15 }
  0x1b   : > { %276 = vmatpush.msra.mxu0 %v755_v3  ;;  %p601_p5 = pnand %p600_p3, %p596_p0 }
  0x1c   : > { %491 = vmatmul.msk.f32.vlgmr.msra.gmra.mxu0 %vm257_vm0, %v250_v4 }
  0x1e   : > { %307 = vperm.xlu0 %563, %v303_v5  }
  0x88   : > { %v255_v6 = vpop.permute.xlu0 %254  ;;  %v313_v30 = vpop.permute.xlu1 %312 }
  0x90   : > { %v308_v26 = vpop.permute.xlu0 %307 }
  0x99   : > { %v278_v7 = vpop.f32.mrf.mxu0 }
  0x9a   : > { %v279_v8 = vadd.f32 %v278_v7, %v255_v6 }
  0x9c   : > { %v492_v10 = vmul.f32 -1.442695, %v279_v8 }
  0x9e   : > { %565 = vpow2.f32 %v492_v10 }
  0xa4   : > { %v566_v11 = vpop.eup %565 }
  0xa5   : > { %v284_v12 = vadd.f32 1.0, %v566_v11 }
  0xa7   : > { %567 = vrcp.f32 %v284_v12  ;;  %v296_v16 = vand.u32 2147483648, %v284_v12  ;;  %v294_v18 = vand.u32 2147483647, %v284_v12  ;;  %vm290_vm2 = vweird.f32 %v284_v12 }
  0xa9   : > { %v297_v20 = vor.u32 1.1754944e-38, %v296_v16  ;;  %vm295_vm4 = vcmp.eq.f32.partialorder %v294_v18, 8.507059e+37 }
  0xad   : > { %v568_v13 = vpop.eup %567 }
  0xae   : > { %v286_v14 = vmul.f32 %v568_v13, %v284_v12  ;;  %vm291_vm1 = vweird.f32 %v568_v13 }
  0xaf   : > { %vm292_vm3 = vmor %vm290_vm2, %vm291_vm1 }
  0xb0   : > { %v287_v15 = vsub.f32 1.0, %v286_v14 }
  0xb2   : > { %v288_v17 = vmul.f32 %v568_v13, %v287_v15 }
  0xb4   : > { %v289_v19 = vadd.f32 %v568_v13, %v288_v17 }
  0xb6   : > { %v293_v21 = vsel %vm292_vm3, %v568_v13, %v289_v19 }
  0xb7   : > { %v298_v22 = vsel %vm295_vm4, %v297_v20, %v293_v21 }
  0xb8   : > { %v300_v23 = vmul.f32 %v298_v22, %v279_v8 }
  0xba   : > { %337 = vmatpush.msra.mxu1 %v300_v23  ;;  %504 = vmatpush.msra.mxu2 %v300_v23 }
  0xbb   : > { %493 = vmatmul.msk.f32.vlgmr.msra.gmra.mxu1 %vm315_vm5, %v301_v24  ;;  %494 = vmatmul.msk.f32.vlgmr.msra.gmra.mxu2 %vm315_vm5, %v302_v25 }
 0x138   : > { %v339_v27 = vpop.f32.mrf.mxu1 }
 0x139   : > { %v340_v28 = vadd.f32 %v339_v27, %v308_v26 }
 0x13b   : > { %v495_v29 = vmul.f32 -1.442695, %v340_v28 }
 0x13d   : > { %569 = vpow2.f32 %v495_v29 }
 0x13e   : > { %v342_v31 = vpop.f32.mrf.mxu2 }
 0x13f   : > { %v343_v32 = vadd.f32 %v342_v31, %v313_v30 }
 0x141   : > { %v496_v33 = vmul.f32 -1.442695, %v343_v32 }
 0x143   : > { %v570_v34 = vpop.eup %569  ;;  %571 = vpow2.f32 %v496_v33 }
 0x144   : > { %v351_v35 = vadd.f32 1.0, %v570_v34 }
 0x146   : > { %573 = vrcp.f32 %v351_v35  ;;  %v364_v41 = vand.u32 2147483648, %v351_v35  ;;  %v362_v43 = vand.u32 2147483647, %v351_v35  ;;  %vm358_vm7 = vweird.f32 %v351_v35 }
 0x148   : > { %v365_v47 = vor.u32 1.1754944e-38, %v364_v41  ;;  %vm363_vm9 = vcmp.eq.f32.partialorder %v362_v43, 8.507059e+37 }
 0x149   : > { %v572_v36 = vpop.eup %571 }
 0x14a   : > { %v352_v37 = vadd.f32 1.0, %v572_v36 }
 0x14c   : > { %v574_v38 = vpop.eup %573  ;;  %575 = vrcp.f32 %v352_v37  ;;  %v379_v50 = vand.u32 2147483648, %v352_v37  ;;  %v377_v53 = vand.u32 2147483647, %v352_v37  ;;  %vm373_vm12 = vweird.f32 %v352_v37 }
 0x14d   : > { %v354_v39 = vmul.f32 %v574_v38, %v351_v35  ;;  %vm359_vm6 = vweird.f32 %v574_v38 }
 0x14e   : > { %vm360_vm8 = vmor %vm358_vm7, %vm359_vm6  ;;  %v380_v56 = vor.u32 1.1754944e-38, %v379_v50  ;;  %vm378_vm14 = vcmp.eq.f32.partialorder %v377_v53, 8.507059e+37 }
 0x14f   : > { %v355_v40 = vsub.f32 1.0, %v354_v39 }
 0x151   : > { %v356_v42 = vmul.f32 %v574_v38, %v355_v40 }
 0x152   : > { %v576_v44 = vpop.eup %575 }
 0x153   : > { %v357_v45 = vadd.f32 %v574_v38, %v356_v42  ;;  %v369_v46 = vmul.f32 %v576_v44, %v352_v37  ;;  %vm374_vm11 = vweird.f32 %v576_v44 }
 0x154   : > { %vm375_vm13 = vmor %vm373_vm12, %vm374_vm11 }
 0x155   : > { %v361_v48 = vsel %vm360_vm8, %v574_v38, %v357_v45  ;;  %v370_v49 = vsub.f32 1.0, %v369_v46 }
 0x156   : > { %v366_v51 = vsel %vm363_vm9, %v365_v47, %v361_v48 }
 0x157   : > { %v371_v52 = vmul.f32 %v576_v44, %v370_v49  ;;  %v383_v54 = vmul.f32 %v366_v51, %v755_v3 }
 0x159   : > { %v372_v55 = vadd.f32 %v576_v44, %v371_v52  ;;  %386 = vst.msk [vmem:[%s239_s21] sm:$0xff] %vm385_vm10, %v383_v54 }
 0x15b   : > { %v376_v57 = vsel %vm375_vm13, %v576_v44, %v372_v55 }
 0x15c   : > { %v381_v58 = vsel %vm378_vm14, %v380_v56, %v376_v57 }
 0x15d   : > { %v384_v59 = vmul.f32 %v381_v58, %v753_v2 }
 0x15f   : > { %387 = vst.msk [vmem:[%s239_s21 + $0x8] sm:$0xff] %vm385_vm10, %v384_v59 }
 0x160   : > { %604 = shalt.err (!%p601_p5)
}
 0x161   : > { %s658_s9 = smov 128   ;;  %s659_s11 = smov 8  }
 0x162   : > { %505 = dma.vmem_to_hbm [thread:$0]  (%p730_p4), %s403_s15, 256, %s405_s16, %s389_s17, %s658_s9, %s658_s9, %s659_s11  }
 0x163 PF: > { %p511_p6 = scmp.ge.s32.totalorder %s655_s23, 2  ;;  %s419_s12 = sand.u32 1, %s635_s18  }
 0x164   : > { %s420_s13 = scalar_lea.sflag [#allocation3], %s419_s12 }
 0x165   : > { %p508_p7 = pnand %p511_p6, %p737_p8 }
 0x167   : > { %p509_p9 = pneg %p508_p7 }
 0x169   : > { %630 = dma.done.wait (%p509_p9), %s420_s13, 256  }
 0x16a   : > { %632 = vsyncadd (%p509_p9), %s420_s13, 4294967040  ;;  %s18_s23 = sadd.s32 1, %s655_s23   ;;  %s827_s18 = smov %s639_s19 }
 0x16b   : > { %p15_p10 = scmp.ge.s32.totalorder %s18_s23, 4   ;;  %s828_s19 = smov %s643_s20 }
 0x16c   : > { %s829_s20 = smov %s743_s6  ;;  %s830_s21 = smov %s651_s22 }
 0x16d   : > { %s831_s22 = smov %s833_s26  ;;  %17 = sbr.rel (!%p15_p10) target bundleno = 4 (0x4), region = 75 }
 0x172   :  { %426 = vsyncpa [#allocation3], 1 }
 0x173   :  { %428 = vsyncpa [#allocation3 + $0x1], 1 }

</bundles_post_ra>
